<compile_context>
chip_gen: v6e
topology: v6e:2x2x1
jax: 0.10.0
libtpu: 0.0.40
codegen_flags: <defaults>
</compile_context>

<pallas_src>
import functools

import jax
import jax.numpy as jnp
from jax.experimental import pallas as pl
from jax.experimental.pallas import tpu as pltpu

_LANES = 128
_SUBLANES = 8


def _cdiv(a: int, b: int) -> int:
    return -(-a // b)


def _tpu_defaults():
    """Per-generation knobs: (num_splits, tile_r, vmem_limit_bytes)."""
    kind = ""
    try:
        kind = jax.devices()[0].device_kind.lower()
    except Exception:
        pass
    if ("v7" in kind) or ("7x" in kind):
        # 2 TensorCores/chip, 64 MiB VMEM per TC, 3.2 TB/s HBM: bigger tiles to
        # amortize the ~0.35us/grid-step overhead; raise the scoped VMEM limit.
        return 2, 16384, 48 * 1024 * 1024
    # v5e / v6e: single TensorCore. Explicit 32 MiB limit is load-bearing on
    # v5e (default scoped VMEM is only 16 MiB).
    return 1, 8192, 32 * 1024 * 1024


def _bce_sum_kernel(pred_ref, label_ref, out_ref, *, rows, tile_r,
                    total_blocks, hard_labels):
    """Accumulates sum_i of y*clamp(log p,-100) + (1-y)*clamp(log(1-p),-100).

    out_ref is an (8, 128) f32 partial-sum block per split; its block index is
    constant along the reduction axis so it stays VMEM-resident. The final
    (tiny) reduction, the negation and the /N happen in the wrapper.
    """
    i = pl.program_id(1)
    blk = pl.program_id(0) * pl.num_programs(1) + i   # logical row-block index

    @pl.when(i == 0)
    def _init():
        out_ref[...] = jnp.zeros_like(out_ref)

    def _accumulate(masked):
        p = pred_ref[...].astype(jnp.float32)
        y = label_ref[...].astype(jnp.float32)   # labels arrive narrow; cast here
        if hard_labels:
            # y in {0,1}: one log per element (halves EUP pushes; the EUP slot
            # is the first to saturate on v7x).
            q = jnp.where(y > 0.5, p, 1.0 - p)
            c = jnp.maximum(jnp.log(q), -100.0)
        else:
            # Soft labels: PyTorch clamps each log at -100 (avoids 0 * -inf).
            log_p = jnp.maximum(jnp.log(p), -100.0)
            log_1mp = jnp.maximum(jnp.log(1.0 - p), -100.0)
            c = log_1mp + y * (log_p - log_1mp)
        if masked:
            # The last row-block may read past the array end; those rows hold
            # garbage (possibly NaN/Inf) -> select (NOT multiply) them to 0.
            valid_rows = rows - blk * tile_r
            row_ids = jax.lax.broadcasted_iota(jnp.int32, c.shape, 0)
            c = jnp.where(row_ids < valid_rows, c, 0.0)
        if tile_r % _SUBLANES == 0:
            # Reduce (tile_r, 128) -> (8, 128) partial sums (vreg-wise adds).
            out_ref[...] += c.reshape(-1, _SUBLANES, _LANES).sum(axis=0)
        else:
            # Tiny single-full-block path (rows not a multiple of 8).
            out_ref[0:1, :] = out_ref[0:1, :] + jnp.sum(c, axis=0, keepdims=True)

    # Hot path: fully in-bounds blocks, no mask.
    @pl.when(blk < total_blocks - 1)
    def _full():
        _accumulate(masked=False)

    # Tail path: last (possibly partial) block, masked.
    @pl.when(blk == total_blocks - 1)
    def _tail():
        _accumulate(masked=True)
    # blk >= total_blocks (clamped duplicate read on the last split): skipped.


def bce_loss(pred: jax.Array, label: jax.Array, *, hard_labels=None,
             num_splits=None, tile_r=None) -> jax.Array:
    """Pallas equivalent of BCELoss().forward(pred, label) (reduction='mean').

    Pass `pred` / `label` in their native dtypes (e.g. bf16 pred, int8/bool
    labels): the kernel casts to f32 internally, so no extra wrapper-side HBM
    pass is added. `hard_labels` defaults to True iff `label` has an integer or
    bool dtype (single-log fast path); float labels use the exact two-log path.
    """
    # TODO(synk): torch.nn.BCELoss asserts pred in [0,1]; out-of-range preds
    #             here silently produce NaN in the mean (no runtime check).
    d_splits, d_tile_r, vmem_limit = _tpu_defaults()
    if num_splits is None:
        num_splits = d_splits
    if tile_r is None:
        tile_r = d_tile_r
    if hard_labels is None:
        hard_labels = (label.dtype == jnp.bool_ or
                       jnp.issubdtype(label.dtype, jnp.integer))

    # --- glue (plain JAX): align batch sizes, flatten to (N,) ---
    n = min(pred.shape[0], label.shape[0])
    if n == 0:
        return jnp.float32(jnp.nan)   # torch mean-reduction over empty input
    pred_flat = pred[:n].reshape(n)
    label_flat = label[:n].reshape(n)

    # --- lane alignment ---
    # If n % 128 == 0 the reshape below is a free metadata op (no HBM copy).
    # Otherwise pad to a lane multiple (one unavoidable copy); p=1, y=1 padding
    # contributes exactly 0 to the sum under the clamped-log semantics.
    rows = _cdiv(n, _LANES)
    n_pad = rows * _LANES
    if n_pad != n:
        pred_flat = jnp.pad(pred_flat, (0, n_pad - n), constant_values=1.0)
        label_flat = jnp.pad(label_flat, (0, n_pad - n), constant_values=1)
    pred2 = pred_flat.reshape(rows, _LANES)
    label2 = label_flat.reshape(rows, _LANES)

    # --- tiling (no rounding of rows to tile granularity) ---
    if rows <= tile_r:
        tile_r = rows                 # single block == full array dims
    total_blocks = _cdiv(rows, tile_r)
    num_splits = max(1, min(num_splits, total_blocks))
    steps = _cdiv(total_blocks, num_splits)

    def in_map(s, i, T=steps, nb=total_blocks):
        # Clamp so the DMA never starts past the array end; the kernel skips
        # the (at most num_splits-1) duplicate reads this creates.
        return (jnp.minimum(s * T + i, nb - 1), 0)

    kernel = functools.partial(_bce_sum_kernel, rows=rows, tile_r=tile_r,
                               total_blocks=total_blocks,
                               hard_labels=bool(hard_labels))

    out = pl.pallas_call(
        kernel,
        out_shape=jax.ShapeDtypeStruct((num_splits * _SUBLANES, _LANES),
                                       jnp.float32),
        grid_spec=pltpu.PrefetchScalarGridSpec(
            num_scalar_prefetch=0,
            grid=(num_splits, steps),
            in_specs=[
                pl.BlockSpec((tile_r, _LANES), in_map),
                pl.BlockSpec((tile_r, _LANES), in_map),
            ],
            out_specs=pl.BlockSpec((_SUBLANES, _LANES), lambda s, i: (s, 0)),
        ),
        compiler_params=pltpu.CompilerParams(
            dimension_semantics=("parallel", "arbitrary"),
            vmem_limit_bytes=vmem_limit,
        ),
    )(pred2, label2)

    # reduction='mean' over the true element count; the negation happens here
    # on a tiny (num_splits*8, 128) array instead of once per element.
    return -jnp.sum(out) / n


if __name__ == "__main__":
    key = jax.random.PRNGKey(0)
    k1, k2, k3, k4, k5, k6 = jax.random.split(key, 6)

    def ref_bce(p, y):
        nn = min(p.shape[0], y.shape[0])
        p = p[:nn].reshape(-1).astype(jnp.float32)
        y = y[:nn].reshape(-1).astype(jnp.float32)
        return jnp.mean(
            -(y * jnp.maximum(jnp.log(p), -100.0)
              + (1.0 - y) * jnp.maximum(jnp.log(1.0 - p), -100.0)))

    # 1) Small case matching the module's usage: pred (batch, 1) of
    #    probabilities (post-sigmoid), label (batch,) of {0., 1.} floats.
    batch = 8
    pred_s = jax.nn.sigmoid(jax.random.normal(k1, (batch, 1), dtype=jnp.float32))
    label_s = jax.random.bernoulli(k2, 0.5, (batch,)).astype(jnp.float32)
    loss_s = bce_loss(pred_s, label_s)
    jax.block_until_ready(loss_s)
    ref_s = ref_bce(pred_s, label_s)
    assert jnp.allclose(loss_s, ref_s, atol=1e-5, rtol=1e-5), (loss_s, ref_s)

    # 2) Soft (float) labels, lane-aligned N (zero-copy path) whose row count
    #    (129) is not a multiple of 8 -> single full-array block path.
    n2 = 129 * 128
    pred_2 = jax.random.uniform(k3, (n2,), dtype=jnp.float32,
                                minval=1e-4, maxval=1.0 - 1e-4)
    label_2 = jax.random.uniform(k4, (n2,), dtype=jnp.float32)
    loss_2 = bce_loss(pred_2, label_2)
    jax.block_until_ready(loss_2)
    ref_2 = ref_bce(pred_2, label_2)
    assert jnp.allclose(loss_2, ref_2, atol=1e-5, rtol=1e-4), (loss_2, ref_2)

    # 3) Mismatched batch sizes, ragged (unaligned) N, int8 hard labels, and a
    #    forced small tile / 2-way split so the multi-block masked-tail and
    #    duplicate-block-skip paths are exercised on any chip generation.
    n_pred, n_label = 70_007, 70_001
    pred_3 = jax.nn.sigmoid(jax.random.normal(k5, (n_pred, 1), dtype=jnp.float32))
    label_3 = jax.random.bernoulli(k6, 0.5, (n_label,)).astype(jnp.int8)
    loss_3 = bce_loss(pred_3, label_3, num_splits=2, tile_r=256)
    jax.block_until_ready(loss_3)
    ref_3 = ref_bce(pred_3, label_3)
    assert jnp.allclose(loss_3, ref_3, atol=1e-5, rtol=1e-4), (loss_3, ref_3)

    print("KERNEL_OK")
</pallas_src>

<mosaic_0001>
module attributes {stable_mosaic.version = 11 : i64} {
  func.func @_bce_sum_kernel(%arg0: i32, %arg1: i32, %arg2: memref<1x128xf32, #tpu.memory_space<vmem>>, %arg3: memref<1x128xf32, #tpu.memory_space<vmem>>, %arg4: memref<8x128xf32, #tpu.memory_space<vmem>>) attributes {dimension_semantics = [#tpu.dimension_semantics<parallel>, #tpu.dimension_semantics<arbitrary>], iteration_bounds = array<i64: 1, 1>, scalar_prefetch = 0 : i64, scratch_operands = 0 : i64, tpu.core_type = #tpu.core_type<tc>, window_params = [{transform_indices = @transform_0, window_bounds = array<i64: 1, 128>}, {transform_indices = @transform_1, window_bounds = array<i64: 1, 128>}, {transform_indices = @transform_2, window_bounds = array<i64: 8, 128>}]} {
    %c1_i32 = arith.constant 1 : i32
    %0 = arith.muli %arg0, %c1_i32 : i32
    %1 = arith.addi %0, %arg1 : i32
    %c0_i32 = arith.constant 0 : i32
    %2 = arith.cmpi eq, %arg1, %c0_i32 : i32
    %3 = arith.extui %2 : i1 to i32
    %c0_i32_0 = arith.constant 0 : i32
    %4 = arith.cmpi ne, %3, %c0_i32_0 : i32
    scf.if %4 {
      %cst = arith.constant 0.000000e+00 : f32
      %11 = vector.broadcast %cst : f32 to vector<8x128xf32>
      %c0 = arith.constant 0 : index
      %c0_5 = arith.constant 0 : index
      %12 = vector.load %arg4[%c0, %c0_5] : memref<8x128xf32, #tpu.memory_space<vmem>>, vector<8x128xf32>
      tpu.vector_store %arg4[%c0, %c0_5], %11 {strides = array<i32>} : memref<8x128xf32, #tpu.memory_space<vmem>>, vector<8x128xf32>,
    } else {
    }
    %c0_i32_1 = arith.constant 0 : i32
    %5 = arith.cmpi slt, %1, %c0_i32_1 : i32
    %6 = arith.extui %5 : i1 to i32
    %c0_i32_2 = arith.constant 0 : i32
    %7 = arith.cmpi ne, %6, %c0_i32_2 : i32
    scf.if %7 {
      %c0 = arith.constant 0 : index
      %c0_5 = arith.constant 0 : index
      %11 = vector.load %arg2[%c0, %c0_5] : memref<1x128xf32, #tpu.memory_space<vmem>>, vector<1x128xf32>
      %c0_6 = arith.constant 0 : index
      %c0_7 = arith.constant 0 : index
      %12 = vector.load %arg3[%c0_6, %c0_7] : memref<1x128xf32, #tpu.memory_space<vmem>>, vector<1x128xf32>
      %13 = math.log %11 : vector<1x128xf32>
      %cst = arith.constant -1.000000e+02 : f32
      %14 = vector.broadcast %cst : f32 to vector<1x128xf32>
      %15 = arith.maximumf %13, %14 : vector<1x128xf32>
      %cst_8 = arith.constant 1.000000e+00 : f32
      %16 = vector.broadcast %cst_8 : f32 to vector<1x128xf32>
      %17 = arith.subf %16, %11 : vector<1x128xf32>
      %18 = math.log %17 : vector<1x128xf32>
      %cst_9 = arith.constant -1.000000e+02 : f32
      %19 = vector.broadcast %cst_9 : f32 to vector<1x128xf32>
      %20 = arith.maximumf %18, %19 : vector<1x128xf32>
      %21 = arith.subf %15, %20 : vector<1x128xf32>
      %22 = arith.mulf %12, %21 : vector<1x128xf32>
      %23 = arith.addf %20, %22 : vector<1x128xf32>
      %c0_10 = arith.constant 0 : index
      %c0_11 = arith.constant 0 : index
      %24 = vector.load %arg4[%c0_10, %c0_11] : memref<8x128xf32, #tpu.memory_space<vmem>>, vector<1x128xf32>
      %cst_12 = arith.constant dense<0.000000e+00> : vector<128xf32>
      %25 = vector.multi_reduction <add>, %23, %cst_12 [0] : vector<1x128xf32> to vector<128xf32>
      %26 = vector.shape_cast %25 : vector<128xf32> to vector<1x128xf32>
      %27 = arith.addf %24, %26 : vector<1x128xf32>
      %c0_13 = arith.constant 0 : index
      %c0_14 = arith.constant 0 : index
      %28 = vector.load %arg4[%c0_13, %c0_14] : memref<8x128xf32, #tpu.memory_space<vmem>>, vector<1x128xf32>
      tpu.vector_store %arg4[%c0_13, %c0_14], %27 {strides = array<i32>} : memref<8x128xf32, #tpu.memory_space<vmem>>, vector<1x128xf32>,
    } else {
    }
    %c0_i32_3 = arith.constant 0 : i32
    %8 = arith.cmpi eq, %1, %c0_i32_3 : i32
    %9 = arith.extui %8 : i1 to i32
    %c0_i32_4 = arith.constant 0 : i32
    %10 = arith.cmpi ne, %9, %c0_i32_4 : i32
    scf.if %10 {
      %c0 = arith.constant 0 : index
      %c0_5 = arith.constant 0 : index
      %11 = vector.load %arg2[%c0, %c0_5] : memref<1x128xf32, #tpu.memory_space<vmem>>, vector<1x128xf32>
      %c0_6 = arith.constant 0 : index
      %c0_7 = arith.constant 0 : index
      %12 = vector.load %arg3[%c0_6, %c0_7] : memref<1x128xf32, #tpu.memory_space<vmem>>, vector<1x128xf32>
      %13 = math.log %11 : vector<1x128xf32>
      %cst = arith.constant -1.000000e+02 : f32
      %14 = vector.broadcast %cst : f32 to vector<1x128xf32>
      %15 = arith.maximumf %13, %14 : vector<1x128xf32>
      %cst_8 = arith.constant 1.000000e+00 : f32
      %16 = vector.broadcast %cst_8 : f32 to vector<1x128xf32>
      %17 = arith.subf %16, %11 : vector<1x128xf32>
      %18 = math.log %17 : vector<1x128xf32>
      %cst_9 = arith.constant -1.000000e+02 : f32
      %19 = vector.broadcast %cst_9 : f32 to vector<1x128xf32>
      %20 = arith.maximumf %18, %19 : vector<1x128xf32>
      %21 = arith.subf %15, %20 : vector<1x128xf32>
      %22 = arith.mulf %12, %21 : vector<1x128xf32>
      %23 = arith.addf %20, %22 : vector<1x128xf32>
      %c1_i32_10 = arith.constant 1 : i32
      %24 = arith.muli %1, %c1_i32_10 : i32
      %c1_i32_11 = arith.constant 1 : i32
      %25 = arith.subi %c1_i32_11, %24 : i32
      %26 = tpu.iota {dimensions = array<i32: 0>} : vector<1x128xi32>
      %27 = vector.broadcast %25 : i32 to vector<1x128xi32>
      %28 = arith.cmpi slt, %26, %27 : vector<1x128xi32>
      %cst_12 = arith.constant 0.000000e+00 : f32
      %29 = vector.broadcast %cst_12 : f32 to vector<1x128xf32>
      %30 = arith.select %28, %23, %29 : vector<1x128xi1>, vector<1x128xf32>
      %c0_13 = arith.constant 0 : index
      %c0_14 = arith.constant 0 : index
      %31 = vector.load %arg4[%c0_13, %c0_14] : memref<8x128xf32, #tpu.memory_space<vmem>>, vector<1x128xf32>
      %cst_15 = arith.constant dense<0.000000e+00> : vector<128xf32>
      %32 = vector.multi_reduction <add>, %30, %cst_15 [0] : vector<1x128xf32> to vector<128xf32>
      %33 = vector.shape_cast %32 : vector<128xf32> to vector<1x128xf32>
      %34 = arith.addf %31, %33 : vector<1x128xf32>
      %c0_16 = arith.constant 0 : index
      %c0_17 = arith.constant 0 : index
      %35 = vector.load %arg4[%c0_16, %c0_17] : memref<8x128xf32, #tpu.memory_space<vmem>>, vector<1x128xf32>
      tpu.vector_store %arg4[%c0_16, %c0_17], %34 {strides = array<i32>} : memref<8x128xf32, #tpu.memory_space<vmem>>, vector<1x128xf32>,
    } else {
    }
    return
  }
  func.func @transform_0(%arg0: i32, %arg1: i32) -> (i32, i32) {
    %c1_i32 = arith.constant 1 : i32
    %0 = arith.muli %arg0, %c1_i32 : i32
    %1 = arith.addi %0, %arg1 : i32
    %c0_i32 = arith.constant 0 : i32
    %2 = arith.minsi %1, %c0_i32 : i32
    %c0_i32_0 = arith.constant 0 : i32
    %c0_i32_1 = arith.constant 0 : i32
    return %2, %c0_i32_0 : i32, i32
  }
  func.func @transform_1(%arg0: i32, %arg1: i32) -> (i32, i32) {
    %c1_i32 = arith.constant 1 : i32
    %0 = arith.muli %arg0, %c1_i32 : i32
    %1 = arith.addi %0, %arg1 : i32
    %c0_i32 = arith.constant 0 : i32
    %2 = arith.minsi %1, %c0_i32 : i32
    %c0_i32_0 = arith.constant 0 : i32
    %c0_i32_1 = arith.constant 0 : i32
    return %2, %c0_i32_0 : i32, i32
  }
  func.func @transform_2(%arg0: i32, %arg1: i32) -> (i32, i32) {
    %c0_i32 = arith.constant 0 : i32
    %c0_i32_0 = arith.constant 0 : i32
    return %arg0, %c0_i32 : i32, i32
  }
}

</mosaic_0001>

<bundles_post_ra>
// kernel: tpu_custom_call.1
= control target key start
LH: loop header
LB: loop body
LE: loop exit
PB: predicated region body
PF: predicated region fallthrough
CT: control target
= control target key end

     0   :  { %7 = vsyncpa [#allocation3], 0  ;;  %s206_s0 = inlined_call_operand.hbm [shape: f32[1,128], index: 0, kind: input, shape index: {}]   ;;  %s207_s1 = inlined_call_operand.vmem [shape: f32[1,128], index: 1, kind: input, shape index: {}]   ;;  %s208_s2 = inlined_call_operand.hbm [shape: f32[8,128], index: 2, kind: output, shape index: {}]  }
   0x1   :  { %8 = vsyncpa [#allocation4], 0  ;;  %s179_s9 = smov [#allocation2]  }
   0x2   :  { %s20_s10 = sshll.u32 %s179_s9, 4  ;;  %s21_s10 = int_to_ptr.vmem [resolvable:$true] %s20_s10 }
   0x3   :  { %s143_s11 = scalar_lea.vmem %s21_s10, 16  ;;  %s147_s12 = scalar_lea.vmem %s21_s10, 32 }
   0x4   :  { %p144_p0 = scmp.ne.s32.totalorder %s21_s10, %s143_s11  ;;  %p148_p1 = scmp.lt.s32.totalorder %s21_s10, %s21_s10 }
   0x5   :  { %p149_p2 = scmp.lt.s32.totalorder %s147_s12, %s143_s11 }
   0x7   :  { %p150_p3 = por %p149_p2, %p148_p1 }
   0x9   :  { %p151_p4 = pnand %p150_p3, %p144_p0 }
   0xb   :  { %154 = shalt.err (!%p151_p4)
}
   0xc   :  { %23 = dma.hbm_to_vmem [thread:$0]  %s206_s0, 16, %s21_s10, [#allocation3]  }
   0xd   :  { %175 = dma.done.wait [#allocation3], 16  }
   0xe   :  { %176 = vsyncadd [#allocation3], 4294967280  ;;  %v180_v0 = vmov 0.0   ;;  %v86_v1 = vld [vmem:[#allocation2] sm:$0x1]  ;;  %v99_v6 = vlaneseq  ;;  %s181_s0 = smov [#allocation5]  }
   0xf   :  { %61 = vst [vmem:[#allocation5] sm:$0xff] %v180_v0  ;;  %131 = vlog2.f32 %v86_v1  ;;  %v91_v2 = vsub.f32 1.0, %v86_v1  ;;  %v87_v10 = vld [vmem:[%s207_s1] sm:$0x1]  ;;  %s114_s17 = sshll.u32 %s181_s0, 4  ;;  %s115_s17 = int_to_ptr.vmem [resolvable:$true] %s114_s17 }
  0x10   :  { %v100_v11 = vshrl.u32 %v99_v6, 7  ;;  %s155_s18 = scalar_lea.vmem %s115_s17, 128  ;;  %p160_p6 = scmp.lt.s32.totalorder %s115_s17, %s115_s17 }
  0x11   :  { %133 = vlog2.f32 %v91_v2  ;;  %p156_p5 = scmp.ne.s32.totalorder %s115_s17, %s155_s18  ;;  %p161_p7 = scmp.lt.s32.totalorder %s155_s18, %s155_s18 }
  0x12   :  { %vm102_vm0 = vcmp.lt.s32.totalorder %v100_v11, 1 }
  0x13   :  { %p162_p8 = por %p161_p7, %p160_p6 }
  0x15   :  { %p163_p9 = pnand %p162_p8, %p156_p5 }
  0x16   :  { %v104_v15 = vld [vmem:[#allocation5] sm:$0x1] }
  0x1c   :  { %v132_v3 = vpop.eup %131 }
  0x1d   :  { %v89_v4 = vmul.f32 0.6931472, %v132_v3 }
  0x1e   :  { %v134_v5 = vpop.eup %133 }
  0x1f   :  { %v90_v7 = vmax.f32 %v89_v4, -100.0  ;;  %v93_v8 = vmul.f32 0.6931472, %v134_v5 }
  0x21   :  { %v94_v9 = vmax.f32 %v93_v8, -100.0 }
  0x23   :  { %v95_v12 = vsub.f32 %v90_v7, %v94_v9 }
  0x25   :  { %v96_v13 = vmul.f32 %v95_v12, %v87_v10 }
  0x27   :  { %v97_v14 = vadd.f32 %v96_v13, %v94_v9 }
  0x29   :  { %v103_v16 = vsel %vm102_vm0, %v97_v14, 0.0 }
  0x2a   :  { %v106_v17 = vadd.f32 %v104_v15, %v103_v16 }
  0x2c   :  { %107 = vst [vmem:[#allocation5] sm:$0x1] %v106_v17 }
  0x2d   :  { %166 = shalt.err (!%p163_p9)
}
  0x2e   :  { %117 = dma.vmem_to_hbm [thread:$0]  %s115_s17, 128, %s208_s2, [#allocation4]  }
  0x2f   :  { %177 = dma.done.wait [#allocation4], 128  }
  0x30   :  { %178 = vsyncadd [#allocation4], 4294967168 }
  0x31   :  { %121 = vsyncpa [#allocation3], 1 }
  0x32   :  { %122 = vsyncpa [#allocation4], 1 }

</bundles_post_ra>
